<compile_context>
chip_gen: v5e
topology: v5e:2x2
jax: 0.10.0
libtpu: 0.0.40
codegen_flags: <defaults>
</compile_context>

<pallas_src>
import functools

import jax
import jax.numpy as jnp
from jax.experimental import pallas as pl
from jax.experimental.pallas import tpu as pltpu

_MIB = 1024 * 1024


def _round_up(x, m):
    return ((x + m - 1) // m) * m


def _vmem_capacity_bytes():
    """Physical VMEM of the local chip; conservative (v7x, 64 MiB) fallback."""
    try:
        cap = getattr(pltpu.get_tpu_info(), "vmem_capacity_bytes", None)
        if cap:
            return int(cap)
    except Exception:
        pass
    return 64 * _MIB


def _triplet_loss_kernel(a_ref, p_ref, n_ref, partial_ref, *,
                         margin, valid_rows, block_rows, feat_dim,
                         need_row_mask, need_lane_mask):
    # Deferred upcast for sub-f32 inputs (bf16 VALU on v6e/v7x): the two
    # differences run in the native dtype, only the product/reduce is f32.
    # f32 inputs take the exact f32 path.
    a = a_ref[...]
    p = p_ref[...]
    n = n_ref[...]
    if a_ref.dtype == jnp.float32:
        diff_np = n - p
        diff_ap = 2.0 * a - p - n
    else:
        diff_np = (n - p).astype(jnp.float32)
        diff_ap = (2.0 * a - p - n).astype(jnp.float32)

    # (a-p)^2 - (a-n)^2 == (n-p) * (2a - p - n):
    # one VALU multiply + one XLU cross-lane reduce per row instead of two.
    prod = diff_np * diff_ap                                    # (TB, D) f32

    if need_lane_mask:
        # Defensive: the block's last dim equals the logical D, but physical
        # VMEM lanes beyond D are unspecified; keep them out of the row sums.
        col_ids = jax.lax.broadcasted_iota(jnp.int32, prod.shape, 1)
        prod = jnp.where(col_ids < feat_dim, prod, 0.0)

    d = jnp.sum(prod, axis=1, keepdims=True)                    # (TB, 1)
    losses = jnp.maximum(d + margin, 0.0)                       # relu

    if need_row_mask:
        # Rows past the true batch size in the trailing block are garbage.
        i = pl.program_id(0)
        row_ids = i * block_rows + jax.lax.broadcasted_iota(
            jnp.int32, losses.shape, 0)
        losses = jnp.where(row_ids < valid_rows, losses, 0.0)

    block_sum = jnp.sum(losses)                                 # scalar f32
    # Lane-dense per-block partial sum (lane 0 is what matters; the broadcast
    # keeps the store a single unmasked-lane write).
    partial_ref[...] = jnp.broadcast_to(block_sum, partial_ref.shape)


def triplet_loss(anchor, positive, negative, margin, size_average=True,
                 block_rows=None):
    """Pallas TPU implementation of TripletLoss.forward. Returns scalar f32."""
    assert anchor.shape == positive.shape == negative.shape
    assert anchor.ndim == 2
    B, D = anchor.shape
    itemsize = jnp.dtype(anchor.dtype).itemsize

    # ---- batch-tile sizing ------------------------------------------------
    # VMEM per tile row (lanes are padded to 128 inside VMEM even though HBM
    # traffic is not): 3 inputs x 2 pipeline buffers in the native dtype plus
    # ~4 tile-sized f32 compute temporaries (upcasts + fused product).
    d_lane = max(_round_up(D, 128), 128)
    bytes_per_row = d_lane * (3 * 2 * itemsize + 4 * 4)

    vmem_cap = _vmem_capacity_bytes()           # 64 MiB v7x, 128 MiB v5e/v6e
    vmem_budget = int(min(max(vmem_cap - 16 * _MIB, 32 * _MIB), 100 * _MIB))

    if block_rows is None:
        # Stream as much as safely fits per step (multi-MiB DMAs amortize the
        # ~0.35 us/step grid overhead); leave 25% VMEM slack.
        block_rows = int((0.75 * vmem_budget) // bytes_per_row)
    block_rows = max(8, (int(block_rows) // 8) * 8)
    block_rows = min(block_rows, 8192)
    if block_rows >= B:
        block_rows = B      # single block; "equal to full dim" is always legal

    num_blocks = -(-B // block_rows)
    need_row_mask = (B % block_rows) != 0
    need_lane_mask = (D % 128) != 0

    kernel = functools.partial(
        _triplet_loss_kernel,
        margin=float(margin),
        valid_rows=int(B),
        block_rows=int(block_rows),
        feat_dim=int(D),
        need_row_mask=bool(need_row_mask),
        need_lane_mask=bool(need_lane_mask),
    )

    # Block last dim = full D  =>  no host-side padding, exact HBM traffic.
    in_spec = pl.BlockSpec((block_rows, D), lambda i: (i, 0))

    cost = pl.CostEstimate(
        flops=6 * B * D + 4 * B,
        transcendentals=0,
        bytes_accessed=3 * B * D * itemsize + num_blocks * 128 * 4,
    )

    partials = pl.pallas_call(
        kernel,
        out_shape=jax.ShapeDtypeStruct((num_blocks, 1, 128), jnp.float32),
        grid=(num_blocks,),
        in_specs=[in_spec, in_spec, in_spec],
        out_specs=pl.BlockSpec((1, 1, 128), lambda i: (i, 0, 0)),
        compiler_params=pltpu.CompilerParams(
            dimension_semantics=("parallel",),   # independent blocks -> megacore
            vmem_limit_bytes=vmem_budget,
        ),
        cost_estimate=cost,
    )(anchor, positive, negative)

    total = jnp.sum(partials[:, 0, 0])
    return total / B if size_average else total


def _reference(anchor, positive, negative, margin, size_average=True):
    dp = jnp.sum((anchor - positive) ** 2, axis=1)
    dn = jnp.sum((anchor - negative) ** 2, axis=1)
    losses = jnp.maximum(dp - dn + margin, 0.0)
    return jnp.mean(losses) if size_average else jnp.sum(losses)


if __name__ == "__main__":
    key = jax.random.PRNGKey(0)
    k1, k2, k3 = jax.random.split(key, 3)

    # Small embedding shapes consistent with the module.
    B, D = 8, 32
    margin = 1.0

    anchor = jax.random.normal(k1, (B, D), dtype=jnp.float32)
    positive = jax.random.normal(k2, (B, D), dtype=jnp.float32)
    negative = jax.random.normal(k3, (B, D), dtype=jnp.float32)

    loss = jax.block_until_ready(
        triplet_loss(anchor, positive, negative, margin, size_average=True))
    ref = _reference(anchor, positive, negative, margin, size_average=True)
    assert jnp.allclose(loss, ref, rtol=1e-4, atol=1e-4), (loss, ref)

    # size_average=False path.
    loss_sum = jax.block_until_ready(
        triplet_loss(anchor, positive, negative, margin, size_average=False))
    ref_sum = _reference(anchor, positive, negative, margin, size_average=False)
    assert jnp.allclose(loss_sum, ref_sum, rtol=1e-4, atol=1e-4), (loss_sum, ref_sum)

    # Multi-block grid + trailing-block row mask + ragged-D path (no padding).
    B2, D2 = 300, 96
    a2 = jax.random.normal(k1, (B2, D2), dtype=jnp.float32)
    p2 = jax.random.normal(k2, (B2, D2), dtype=jnp.float32)
    n2 = jax.random.normal(k3, (B2, D2), dtype=jnp.float32)
    loss2 = jax.block_until_ready(
        triplet_loss(a2, p2, n2, margin, size_average=True, block_rows=128))
    ref2 = _reference(a2, p2, n2, margin, size_average=True)
    assert jnp.allclose(loss2, ref2, rtol=1e-4, atol=1e-4), (loss2, ref2)

    print("KERNEL_OK")
</pallas_src>

<mosaic_0001>
module attributes {stable_mosaic.version = 11 : i64} {
  func.func @_triplet_loss_kernel(%arg0: i32, %arg1: memref<8x32xf32, #tpu.memory_space<vmem>>, %arg2: memref<8x32xf32, #tpu.memory_space<vmem>>, %arg3: memref<8x32xf32, #tpu.memory_space<vmem>>, %arg4: memref<1x1x128xf32, #tpu.memory_space<vmem>>) attributes {dimension_semantics = [#tpu.dimension_semantics<parallel>], iteration_bounds = array<i64: 1>, scalar_prefetch = 0 : i64, scratch_operands = 0 : i64, tpu.core_type = #tpu.core_type<tc>, window_params = [{transform_indices = @transform_0, window_bounds = array<i64: 8, 32>}, {transform_indices = @transform_1, window_bounds = array<i64: 8, 32>}, {transform_indices = @transform_2, window_bounds = array<i64: 8, 32>}, {transform_indices = @transform_3, window_bounds = array<i64: 1, 1, 128>}]} {
    %c0 = arith.constant 0 : index
    %c0_0 = arith.constant 0 : index
    %0 = vector.load %arg1[%c0, %c0_0] : memref<8x32xf32, #tpu.memory_space<vmem>>, vector<8x32xf32>
    %c0_1 = arith.constant 0 : index
    %c0_2 = arith.constant 0 : index
    %1 = vector.load %arg2[%c0_1, %c0_2] : memref<8x32xf32, #tpu.memory_space<vmem>>, vector<8x32xf32>
    %c0_3 = arith.constant 0 : index
    %c0_4 = arith.constant 0 : index
    %2 = vector.load %arg3[%c0_3, %c0_4] : memref<8x32xf32, #tpu.memory_space<vmem>>, vector<8x32xf32>
    %3 = arith.subf %2, %1 : vector<8x32xf32>
    %cst = arith.constant 2.000000e+00 : f32
    %4 = vector.broadcast %cst : f32 to vector<8x32xf32>
    %5 = arith.mulf %4, %0 : vector<8x32xf32>
    %6 = arith.subf %5, %1 : vector<8x32xf32>
    %7 = arith.subf %6, %2 : vector<8x32xf32>
    %8 = arith.mulf %3, %7 : vector<8x32xf32>
    %9 = tpu.iota {dimensions = array<i32: 1>} : vector<8x32xi32>
    %c32_i32 = arith.constant 32 : i32
    %10 = vector.broadcast %c32_i32 : i32 to vector<8x32xi32>
    %11 = arith.cmpi slt, %9, %10 : vector<8x32xi32>
    %cst_5 = arith.constant 0.000000e+00 : f32
    %12 = vector.broadcast %cst_5 : f32 to vector<8x32xf32>
    %13 = arith.select %11, %8, %12 : vector<8x32xi1>, vector<8x32xf32>
    %cst_6 = arith.constant dense<0.000000e+00> : vector<8xf32>
    %14 = vector.multi_reduction <add>, %13, %cst_6 [1] : vector<8x32xf32> to vector<8xf32>
    %15 = vector.shape_cast %14 : vector<8xf32> to vector<8x1xf32>
    %cst_7 = arith.constant 1.000000e+00 : f32
    %16 = vector.broadcast %cst_7 : f32 to vector<8x1xf32>
    %17 = arith.addf %15, %16 : vector<8x1xf32>
    %cst_8 = arith.constant 0.000000e+00 : f32
    %18 = vector.broadcast %cst_8 : f32 to vector<8x1xf32>
    %19 = arith.maximumf %17, %18 : vector<8x1xf32>
    %20 = vector.shape_cast %19 : vector<8x1xf32> to vector<1x8x1xf32>
    %cst_9 = arith.constant dense<0.000000e+00> : vector<1xf32>
    %21 = vector.multi_reduction <add>, %20, %cst_9 [1, 2] : vector<1x8x1xf32> to vector<1xf32>
    %22 = vector.shape_cast %21 : vector<1xf32> to vector<1x1x1xf32>
    %23 = vector.extract %22[0, 0, 0] : f32 from vector<1x1x1xf32>
    %24 = vector.broadcast %23 : f32 to vector<1x1x128xf32>
    %c0_10 = arith.constant 0 : index
    %c0_11 = arith.constant 0 : index
    %c0_12 = arith.constant 0 : index
    %25 = vector.load %arg4[%c0_10, %c0_11, %c0_12] : memref<1x1x128xf32, #tpu.memory_space<vmem>>, vector<1x1x128xf32>
    tpu.vector_store %arg4[%c0_10, %c0_11, %c0_12], %24 {strides = array<i32>} : memref<1x1x128xf32, #tpu.memory_space<vmem>>, vector<1x1x128xf32>,
    return
  }
  func.func @transform_0(%arg0: i32) -> (i32, i32) {
    %c0_i32 = arith.constant 0 : i32
    %c0_i32_0 = arith.constant 0 : i32
    return %arg0, %c0_i32 : i32, i32
  }
  func.func @transform_1(%arg0: i32) -> (i32, i32) {
    %c0_i32 = arith.constant 0 : i32
    %c0_i32_0 = arith.constant 0 : i32
    return %arg0, %c0_i32 : i32, i32
  }
  func.func @transform_2(%arg0: i32) -> (i32, i32) {
    %c0_i32 = arith.constant 0 : i32
    %c0_i32_0 = arith.constant 0 : i32
    return %arg0, %c0_i32 : i32, i32
  }
  func.func @transform_3(%arg0: i32) -> (i32, i32, i32) {
    %c0_i32 = arith.constant 0 : i32
    %c0_i32_0 = arith.constant 0 : i32
    %c0_i32_1 = arith.constant 0 : i32
    return %arg0, %c0_i32, %c0_i32_0 : i32, i32, i32
  }
}

</mosaic_0001>

<bundles_post_ra>
// kernel: tpu_custom_call.1
= control target key start
LH: loop header
LB: loop body
LE: loop exit
PB: predicated region body
PF: predicated region fallthrough
CT: control target
= control target key end

     0   :  { %8 = vsyncpa [#allocation3], 0  ;;  %s249_s0 = inlined_call_operand.hbm [shape: f32[8,32], index: 0, kind: input, shape index: {}]   ;;  %s250_s1 = inlined_call_operand.hbm [shape: f32[8,32], index: 1, kind: input, shape index: {}]   ;;  %s251_s2 = inlined_call_operand.hbm [shape: f32[8,32], index: 2, kind: input, shape index: {}]   ;;  %s252_s3 = inlined_call_operand.hbm [shape: f32[1,1,128], index: 3, kind: output, shape index: {}]  }
   0x1   :  { %9 = vsyncpa [#allocation6], 0  ;;  %s27_s14 = sshll.u32 %s250_s1, 4  ;;  %s28_s14 = int_to_ptr.hbm [resolvable:$true] %s27_s14 }
   0x2   :  { %10 = vsyncpa [#allocation4], 0  ;;  %s213_s15 = smov [#allocation5]   ;;  %s16_s19 = sshll.u32 %s249_s0, 4  ;;  %s17_s19 = int_to_ptr.hbm [resolvable:$true] %s16_s19 }
   0x3   :  { %s29_s16 = sshll.u32 %s213_s15, 4  ;;  %s214_s20 = smov [#allocation2]   ;;  %s30_s16 = int_to_ptr.vmem [resolvable:$true] %s29_s16 }
   0x4   :  { %32 = dma.hbm_to_vmem [thread:$0]  %s28_s14, 128, %s30_s16, [#allocation6]  }
   0x5   :  { %s18_s21 = sshll.u32 %s214_s20, 4  ;;  %s38_s24 = sshll.u32 %s251_s2, 4  ;;  %s19_s21 = int_to_ptr.vmem [resolvable:$true] %s18_s21  ;;  %s39_s24 = int_to_ptr.hbm [resolvable:$true] %s38_s24 }
   0x6   :  { %21 = dma.hbm_to_vmem [thread:$0]  %s17_s19, 128, %s19_s21, [#allocation3]  }
   0x7   :  { %s215_s1 = smov [#allocation7]  }
   0x8   :  { %s40_s25 = sshll.u32 %s215_s1, 4  ;;  %s41_s25 = int_to_ptr.vmem [resolvable:$true] %s40_s25 }
   0x9   :  { %43 = dma.hbm_to_vmem [thread:$0]  %s39_s24, 128, %s41_s25, [#allocation6]  }
   0xa   :  { %207 = dma.done.wait [#allocation3], 128  }
   0xb   :  { %208 = vsyncadd [#allocation3], 4294967168 }
   0xc   :  { %209 = dma.done.wait [#allocation6], 256  }
   0xd   :  { %210 = vsyncadd [#allocation6], 4294967040  ;;  %v64_v0 = vlaneseq  ;;  %v56_v1 = vld [vmem:[#allocation2] sm:$0xff]  ;;  %v57_v2 = vld [vmem:[#allocation5] sm:$0xff]  ;;  %vm68_vm1 = vcmask 261120   ;;  %vm74_vm2 = vcmask 7168  }
   0xe   :  { %v58_v3 = vld [vmem:[#allocation7] sm:$0xff]  ;;  %v60_v4 = vmul.f32 2.0, %v56_v1  ;;  %s216_s0 = smov [#allocation8]   ;;  %s94_s28 = sshll.u32 %s252_s3, 4  ;;  %s95_s28 = int_to_ptr.hbm [resolvable:$true] %s94_s28 }
   0xf   :  { %v65_v5 = vand.u32 127, %v64_v0  ;;  %v59_v6 = vsub.f32 %v58_v3, %v57_v2  ;;  %s92_s2 = sshll.u32 %s216_s0, 4  ;;  %s93_s2 = int_to_ptr.vmem [resolvable:$true] %s92_s2 }
  0x10   :  { %v61_v7 = vsub.f32 %v60_v4, %v57_v2 }
  0x11   :  { %vm66_vm0 = vcmp.lt.s32.totalorder %v65_v5, 32 }
  0x12   :  { %v62_v8 = vsub.f32 %v61_v7, %v58_v3 }
  0x14   :  { %v63_v9 = vmul.f32 %v62_v8, %v59_v6 }
  0x16   :  { %v67_v10 = vsel %vm66_vm0, %v63_v9, 0.0 }
  0x17   :  { %v69_v11 = vsel %vm68_vm1, %v67_v10, 0.0 }
  0x18   :  { %70 = vadd.xlane.f32.xlu0 %v69_v11 }
  0x8b   :  { %v71_v12 = vpop.xlane.xlu0 %70 }
  0x8c   :  { %v72_v13 = vadd.f32 1.0, %v71_v12 }
  0x8e   :  { %v73_v14 = vmax.f32 %v72_v13, 0.0 }
  0x90   :  { %v75_v15 = vsel %vm74_vm2, %v73_v14, 0.0 }
  0x91   :  { %76 = vadd.xlane.f32.xlu0 %v75_v15 }
 0x104   :  { %v77_v16 = vpop.xlane.xlu0 %76 }
 0x105   :  { %v78_v17 = vrot.slane %v77_v16, 4 }
 0x107   :  { %v79_v18 = vadd.f32 %v78_v17, %v77_v16 }
 0x109   :  { %v80_v19 = vrot.slane %v79_v18, 2 }
 0x10b   :  { %v81_v20 = vadd.f32 %v80_v19, %v79_v18 }
 0x10d   :  { %v82_v21 = vrot.slane %v81_v20, 1 }
 0x10f   :  { %v83_v22 = vadd.f32 %v82_v21, %v81_v20 }
 0x111   :  { %105 = vpush %v83_v22 }
 0x142   :  { %s106_s29 = spop %105 }
 0x143   :  { %v85_v23 = vstv %s106_s29 }
 0x144   :  { %86 = vst [vmem:[#allocation8] sm:$0x1] %v85_v23 }
 0x145   :  { %97 = dma.vmem_to_hbm [thread:$0]  %s93_s2, 16, %s95_s28, [#allocation4]  }
 0x146   :  { %211 = dma.done.wait [#allocation4], 16  }
 0x147   :  { %212 = vsyncadd [#allocation4], 4294967280 }
 0x148   :  { %102 = vsyncpa [#allocation3], 1 }
 0x149   :  { %103 = vsyncpa [#allocation6], 1 }
 0x14a   :  { %104 = vsyncpa [#allocation4], 1 }

</bundles_post_ra>
